<compile_context>
chip_gen: v7x
topology: tpu7x:2x2x1
jax: 0.10.0
libtpu: 0.0.40
codegen_flags: <defaults>
</compile_context>

<pallas_src>
import functools

import numpy as np

import jax
import jax.numpy as jnp
from jax.experimental import pallas as pl
from jax.experimental.pallas import tpu as pltpu


def fire_block_pool_kernel(
    x_ref,         # (1, Cin, H*W)      f32   one image, channels x flat spatial
    w_sq_ref,      # (S, Cin)           bf16  (BN scale folded in)
    sq_shift_ref,  # (S, 1)             f32
    w_e1_ref,      # (E1, S)            bf16  (BN scale folded in)
    w_e2_ref,      # (E2, 9*S)          bf16  (BN scale folded in, (ky,kx,s) order)
    e_shift_ref,   # (E1+E2, 1)         f32
    masks_ref,     # (9, 1, H*W)        f32   0/1 border-validity masks per tap
    pool_ref,      # (H*W, Ho*Wo)       bf16  avg-pool matrix
    out_ref,       # (1, E1+E2, Ho*Wo)  f32
    *,
    W,
):
    S = w_sq_ref.shape[0]
    HW = x_ref.shape[-1]

    # ---- squeeze: 1x1 conv (bf16 MXU, f32 acc) + folded-BN shift + ReLU ----
    x_bf = x_ref[0].astype(jnp.bfloat16)                            # (Cin, HW)
    sq = jnp.dot(w_sq_ref[...], x_bf, preferred_element_type=jnp.float32)
    sq = jnp.maximum(sq + sq_shift_ref[...], 0.0)                   # (S, HW) f32

    # ---- expand1: 1x1 conv (unpooled; pooling fused with expand2 below) ----
    e1 = jnp.dot(w_e1_ref[...], sq.astype(jnp.bfloat16),
                 preferred_element_type=jnp.float32)                # (E1, HW)

    # ---- expand2: 3x3 conv (padding=1) as roll+mask im2col + one matmul ----
    # Window (ky, kx) needs sq shifted by d = (ky-1)*W + (kx-1) flattened
    # pixels, i.e. a lane roll by -d (static), with out-of-image positions
    # zeroed by a precomputed mask.  Rolls run on the XLU; each window is a
    # tile-aligned 8-sublane piece, so the sublane concat is a cheap placement.
    wins = []
    for ky in range(3):
        for kx in range(3):
            idx = ky * 3 + kx
            shift = ((1 - ky) * W + (1 - kx)) % HW                  # static >= 0
            win = sq if shift == 0 else pltpu.roll(sq, shift, axis=1)
            if idx != 4:                                            # center tap: no mask
                win = win * masks_ref[idx]                          # (1,HW) bcast
            wins.append(win)
    cols = jnp.concatenate(wins, axis=0).astype(jnp.bfloat16)       # (9*S, HW)
    e2 = jnp.dot(w_e2_ref[...], cols,
                 preferred_element_type=jnp.float32)                # (E2, HW)

    # ---- concat channels (sublane axis), avg-pool both branches with one ----
    # ---- matmul, add BN shifts (commute with pooling), ReLU, store.      ----
    e12 = jnp.concatenate([e1, e2], axis=0).astype(jnp.bfloat16)    # (E1+E2, HW)
    pooled = jnp.dot(e12, pool_ref[...],
                     preferred_element_type=jnp.float32)            # (E1+E2, Ho*Wo)
    out_ref[0] = jnp.maximum(pooled + e_shift_ref[...], 0.0).astype(out_ref.dtype)
    # Note: Ho*Wo = 64 lanes at toy size (half-masked store); at production
    # SqueezeNet spatial sizes Ho*Wo >= 169 so the output store is lane-dense.


def fire_block_pool(x_nchw, params, *, pk, ps):
    """x_nchw: (B, Cin, H, W) float32. Returns (B, E1+E2, Ho, Wo) float32."""
    B, Cin, H, W = x_nchw.shape
    S = params["w_sq"].shape[0]
    E1 = params["w_e1"].shape[0]
    E2 = params["w_e2"].shape[0]
    Ho, Wo = (H - pk) // ps + 1, (W - pk) // ps + 1
    HW, HoWo = H * W, Ho * Wo

    # Fold BN (inference form) into per-channel scale/shift; fold the scale
    # into the conv weights (trace-time constant folding on parameters).
    eps = 1e-5

    def fold(g, b, m, v):
        scale = g / jnp.sqrt(v + eps)
        return scale, b - m * scale

    sq_scale, sq_shift = fold(*params["bn_sq"])
    e1_scale, e1_shift = fold(*params["bn_e1"])
    e2_scale, e2_shift = fold(*params["bn_e2"])

    w_sq = (params["w_sq"] * sq_scale[:, None]).astype(jnp.bfloat16)       # (S, Cin)
    w_e1 = (params["w_e1"] * e1_scale[:, None]).astype(jnp.bfloat16)       # (E1, S)
    w_e2 = params["w_e2"] * e2_scale[:, None, None, None]                  # (E2,S,3,3)
    w_e2 = jnp.transpose(w_e2, (0, 2, 3, 1)).reshape(E2, 9 * S)            # (ky,kx,s)
    w_e2 = w_e2.astype(jnp.bfloat16)                                       # (E2, 9S)
    sq_shift = sq_shift[:, None].astype(jnp.float32)                       # (S, 1)
    e_shift = jnp.concatenate([e1_shift, e2_shift])[:, None].astype(jnp.float32)

    # Precomputed constants (numpy, host-side): border-validity masks for the 9
    # conv taps and the average-pooling matrix.  Both are tiny and stay resident
    # in VMEM across the grid (constant index maps).
    row = np.arange(HW) // W
    col = np.arange(HW) % W
    masks = np.ones((9, 1, HW), np.float32)
    for ky in range(3):
        for kx in range(3):
            valid = np.ones(HW, bool)
            if ky == 0:
                valid &= row >= 1
            if ky == 2:
                valid &= row <= H - 2
            if kx == 0:
                valid &= col >= 1
            if kx == 2:
                valid &= col <= W - 2
            masks[ky * 3 + kx, 0, :] = valid.astype(np.float32)
    masks = jnp.asarray(masks)

    pool_mat = np.zeros((HW, HoWo), np.float32)
    inv = 1.0 / float(pk * pk)
    for ho in range(Ho):
        for wo in range(Wo):
            for dy in range(pk):
                for dx in range(pk):
                    pool_mat[(ho * ps + dy) * W + (wo * ps + dx), ho * Wo + wo] = inv
    pool_mat = jnp.asarray(pool_mat, dtype=jnp.bfloat16)

    # NCHW -> (B, Cin, H*W) is a free reshape; stays f32 (cast to bf16 in-kernel).
    x = x_nchw.reshape(B, Cin, HW)

    kernel = functools.partial(fire_block_pool_kernel, W=W)
    const = lambda shape: pl.BlockSpec(shape, lambda b, _s=shape: (0,) * len(_s))

    out = pl.pallas_call(
        kernel,
        out_shape=jax.ShapeDtypeStruct((B, E1 + E2, HoWo), jnp.float32),
        grid_spec=pltpu.PrefetchScalarGridSpec(
            num_scalar_prefetch=0,
            grid=(B,),
            in_specs=[
                pl.BlockSpec((1, Cin, HW), lambda b: (b, 0, 0)),
                const((S, Cin)),
                const((S, 1)),
                const((E1, S)),
                const((E2, 9 * S)),
                const((E1 + E2, 1)),
                const((9, 1, HW)),
                const((HW, HoWo)),
            ],
            out_specs=pl.BlockSpec((1, E1 + E2, HoWo), lambda b: (b, 0, 0)),
        ),
        compiler_params=pltpu.CompilerParams(
            dimension_semantics=("parallel",)),   # images independent (v7x megacore)
    )(x, w_sq, sq_shift, w_e1, w_e2, e_shift, masks, pool_mat)

    return out.reshape(B, E1 + E2, Ho, Wo)        # already NCHW; free reshape


def reference(x_nchw, params, *, pk, ps):
    """Pure-JAX f32 NCHW reference, for correctness checking."""
    eps = 1e-5

    def bn(y, g, b, m, v):
        s = (1, -1, 1, 1)
        return (y - m.reshape(s)) / jnp.sqrt(v.reshape(s) + eps) * g.reshape(s) \
            + b.reshape(s)

    def pool(y):
        s = jax.lax.reduce_window(y, 0.0, jax.lax.add,
                                  window_dimensions=(1, 1, pk, pk),
                                  window_strides=(1, 1, ps, ps),
                                  padding="VALID")
        return s / float(pk * pk)

    x = x_nchw.astype(jnp.float32)
    sq = jnp.einsum("nchw,sc->nshw", x, params["w_sq"])
    sq = jnp.maximum(bn(sq, *params["bn_sq"]), 0.0)

    e1 = jnp.einsum("nshw,es->nehw", sq, params["w_e1"])
    e1 = pool(bn(e1, *params["bn_e1"]))

    e2 = jax.lax.conv_general_dilated(
        sq, params["w_e2"], window_strides=(1, 1),
        padding=((1, 1), (1, 1)),
        dimension_numbers=("NCHW", "OIHW", "NCHW"))
    e2 = pool(bn(e2, *params["bn_e2"]))

    return jnp.maximum(jnp.concatenate([e1, e2], axis=1), 0.0)


def make_params(key, in_channel, s1x1, e1x1, e3x3):
    ks = jax.random.split(key, 6)

    def bn_params(k, c):
        k1, k2, k3, k4 = jax.random.split(k, 4)
        gamma = jax.random.uniform(k1, (c,), jnp.float32, 0.5, 1.5)
        beta = jax.random.normal(k2, (c,), jnp.float32) * 0.1
        mean = jax.random.normal(k3, (c,), jnp.float32) * 0.1
        var = jax.random.uniform(k4, (c,), jnp.float32, 0.5, 1.5)
        return (gamma, beta, mean, var)

    return {
        # PyTorch layouts: 1x1 convs (out, in); 3x3 conv OIHW.
        "w_sq": jax.random.normal(ks[0], (s1x1, in_channel), jnp.float32) * 0.2,
        "bn_sq": bn_params(ks[1], s1x1),
        "w_e1": jax.random.normal(ks[2], (e1x1, s1x1), jnp.float32) * 0.2,
        "bn_e1": bn_params(ks[3], e1x1),
        "w_e2": jax.random.normal(ks[4], (e3x3, s1x1, 3, 3), jnp.float32) * 0.1,
        "bn_e2": bn_params(ks[5], e3x3),
    }


if __name__ == "__main__":
    B, Cin, H, W = 2, 4, 16, 16
    s1x1, e1x1, e3x3 = 8, 8, 8
    pk, ps = 2, 2

    key = jax.random.PRNGKey(0)
    kx, kp = jax.random.split(key)
    x = jax.random.normal(kx, (B, Cin, H, W), jnp.float32)
    params = make_params(kp, Cin, s1x1, e1x1, e3x3)

    out = jax.block_until_ready(fire_block_pool(x, params, pk=pk, ps=ps))
    ref = jax.block_until_ready(reference(x, params, pk=pk, ps=ps))

    assert out.shape == (B, e1x1 + e3x3, H // ps, W // ps), out.shape
    # bf16 MXU operands (f32 accumulation) vs. a pure-f32 reference.
    assert jnp.allclose(out, ref, rtol=2e-2, atol=2e-2), \
        float(jnp.max(jnp.abs(out - ref)))

    print("KERNEL_OK")
</pallas_src>

<mosaic_0001>
module attributes {stable_mosaic.version = 11 : i64} {
  func.func @fire_block_pool_kernel(%arg0: i32, %arg1: memref<1x4x256xf32, #tpu.memory_space<vmem>>, %arg2: memref<8x4xbf16, #tpu.memory_space<vmem>>, %arg3: memref<8x1xf32, #tpu.memory_space<vmem>>, %arg4: memref<8x8xbf16, #tpu.memory_space<vmem>>, %arg5: memref<8x72xbf16, #tpu.memory_space<vmem>>, %arg6: memref<16x1xf32, #tpu.memory_space<vmem>>, %arg7: memref<9x1x256xf32, #tpu.memory_space<vmem>>, %arg8: memref<256x64xbf16, #tpu.memory_space<vmem>>, %arg9: memref<1x16x64xf32, #tpu.memory_space<vmem>>) attributes {dimension_semantics = [#tpu.dimension_semantics<parallel>], iteration_bounds = array<i64: 2>, scalar_prefetch = 0 : i64, scratch_operands = 0 : i64, tpu.core_type = #tpu.core_type<tc>, window_params = [{transform_indices = @transform_0, window_bounds = array<i64: 1, 4, 256>}, {pipeline_mode = #tpu.pipeline_mode<synchronous>, transform_indices = @transform_1, window_bounds = array<i64: 8, 4>}, {pipeline_mode = #tpu.pipeline_mode<synchronous>, transform_indices = @transform_2, window_bounds = array<i64: 8, 1>}, {pipeline_mode = #tpu.pipeline_mode<synchronous>, transform_indices = @transform_3, window_bounds = array<i64: 8, 8>}, {pipeline_mode = #tpu.pipeline_mode<synchronous>, transform_indices = @transform_4, window_bounds = array<i64: 8, 72>}, {pipeline_mode = #tpu.pipeline_mode<synchronous>, transform_indices = @transform_5, window_bounds = array<i64: 16, 1>}, {pipeline_mode = #tpu.pipeline_mode<synchronous>, transform_indices = @transform_6, window_bounds = array<i64: 9, 1, 256>}, {pipeline_mode = #tpu.pipeline_mode<synchronous>, transform_indices = @transform_7, window_bounds = array<i64: 256, 64>}, {transform_indices = @transform_8, window_bounds = array<i64: 1, 16, 64>}]} {
    %c0 = arith.constant 0 : index
    %c0_0 = arith.constant 0 : index
    %c0_1 = arith.constant 0 : index
    %0 = vector.load %arg1[%c0, %c0_0, %c0_1] : memref<1x4x256xf32, #tpu.memory_space<vmem>>, vector<1x4x256xf32>
    %1 = vector.shape_cast %0 : vector<1x4x256xf32> to vector<4x256xf32>
    %2 = arith.truncf %1 : vector<4x256xf32> to vector<4x256xbf16>
    %c0_2 = arith.constant 0 : index
    %c0_3 = arith.constant 0 : index
    %3 = vector.load %arg2[%c0_2, %c0_3] : memref<8x4xbf16, #tpu.memory_space<vmem>>, vector<8x4xbf16>
    %cst = arith.constant dense<0.000000e+00> : vector<8x256xf32>
    %4 = tpu.matmul %3, %2, %cst {dimension_numbers = #tpu.dot_dimension_numbers<[1], [0], [0], [1], [0, 0, 1, 1], [], []>} : vector<8x4xbf16>, vector<4x256xbf16>, vector<8x256xf32> -> vector<8x256xf32>
    %c0_4 = arith.constant 0 : index
    %c0_5 = arith.constant 0 : index
    %5 = vector.load %arg3[%c0_4, %c0_5] : memref<8x1xf32, #tpu.memory_space<vmem>>, vector<8x1xf32>
    %6 = vector.broadcast %5 : vector<8x1xf32> to vector<8x256xf32>
    %7 = arith.addf %4, %6 : vector<8x256xf32>
    %cst_6 = arith.constant 0.000000e+00 : f32
    %8 = vector.broadcast %cst_6 : f32 to vector<8x256xf32>
    %9 = arith.maximumf %7, %8 : vector<8x256xf32>
    %c0_7 = arith.constant 0 : index
    %c0_8 = arith.constant 0 : index
    %10 = vector.load %arg4[%c0_7, %c0_8] : memref<8x8xbf16, #tpu.memory_space<vmem>>, vector<8x8xbf16>
    %11 = arith.truncf %9 : vector<8x256xf32> to vector<8x256xbf16>
    %cst_9 = arith.constant dense<0.000000e+00> : vector<8x256xf32>
    %12 = tpu.matmul %10, %11, %cst_9 {dimension_numbers = #tpu.dot_dimension_numbers<[1], [0], [0], [1], [0, 0, 1, 1], [], []>} : vector<8x8xbf16>, vector<8x256xbf16>, vector<8x256xf32> -> vector<8x256xf32>
    %c17_i32 = arith.constant 17 : i32
    %13 = tpu.dynamic_rotate %9 by %c17_i32 dim 1 : vector<8x256xf32>, i32 -> vector<8x256xf32>
    %c0_10 = arith.constant 0 : index
    %c0_11 = arith.constant 0 : index
    %c0_12 = arith.constant 0 : index
    %14 = vector.load %arg7[%c0_10, %c0_11, %c0_12] : memref<9x1x256xf32, #tpu.memory_space<vmem>>, vector<1x1x256xf32>
    %15 = vector.shape_cast %14 : vector<1x1x256xf32> to vector<1x256xf32>
    %16 = vector.broadcast %15 : vector<1x256xf32> to vector<8x256xf32>
    %17 = arith.mulf %13, %16 : vector<8x256xf32>
    %c16_i32 = arith.constant 16 : i32
    %18 = tpu.dynamic_rotate %9 by %c16_i32 dim 1 : vector<8x256xf32>, i32 -> vector<8x256xf32>
    %c1 = arith.constant 1 : index
    %c0_13 = arith.constant 0 : index
    %c0_14 = arith.constant 0 : index
    %19 = vector.load %arg7[%c1, %c0_13, %c0_14] : memref<9x1x256xf32, #tpu.memory_space<vmem>>, vector<1x1x256xf32>
    %20 = vector.shape_cast %19 : vector<1x1x256xf32> to vector<1x256xf32>
    %21 = vector.broadcast %20 : vector<1x256xf32> to vector<8x256xf32>
    %22 = arith.mulf %18, %21 : vector<8x256xf32>
    %c15_i32 = arith.constant 15 : i32
    %23 = tpu.dynamic_rotate %9 by %c15_i32 dim 1 : vector<8x256xf32>, i32 -> vector<8x256xf32>
    %c2 = arith.constant 2 : index
    %c0_15 = arith.constant 0 : index
    %c0_16 = arith.constant 0 : index
    %24 = vector.load %arg7[%c2, %c0_15, %c0_16] : memref<9x1x256xf32, #tpu.memory_space<vmem>>, vector<1x1x256xf32>
    %25 = vector.shape_cast %24 : vector<1x1x256xf32> to vector<1x256xf32>
    %26 = vector.broadcast %25 : vector<1x256xf32> to vector<8x256xf32>
    %27 = arith.mulf %23, %26 : vector<8x256xf32>
    %c1_i32 = arith.constant 1 : i32
    %28 = tpu.dynamic_rotate %9 by %c1_i32 dim 1 : vector<8x256xf32>, i32 -> vector<8x256xf32>
    %c3 = arith.constant 3 : index
    %c0_17 = arith.constant 0 : index
    %c0_18 = arith.constant 0 : index
    %29 = vector.load %arg7[%c3, %c0_17, %c0_18] : memref<9x1x256xf32, #tpu.memory_space<vmem>>, vector<1x1x256xf32>
    %30 = vector.shape_cast %29 : vector<1x1x256xf32> to vector<1x256xf32>
    %31 = vector.broadcast %30 : vector<1x256xf32> to vector<8x256xf32>
    %32 = arith.mulf %28, %31 : vector<8x256xf32>
    %c255_i32 = arith.constant 255 : i32
    %33 = tpu.dynamic_rotate %9 by %c255_i32 dim 1 : vector<8x256xf32>, i32 -> vector<8x256xf32>
    %c5 = arith.constant 5 : index
    %c0_19 = arith.constant 0 : index
    %c0_20 = arith.constant 0 : index
    %34 = vector.load %arg7[%c5, %c0_19, %c0_20] : memref<9x1x256xf32, #tpu.memory_space<vmem>>, vector<1x1x256xf32>
    %35 = vector.shape_cast %34 : vector<1x1x256xf32> to vector<1x256xf32>
    %36 = vector.broadcast %35 : vector<1x256xf32> to vector<8x256xf32>
    %37 = arith.mulf %33, %36 : vector<8x256xf32>
    %c241_i32 = arith.constant 241 : i32
    %38 = tpu.dynamic_rotate %9 by %c241_i32 dim 1 : vector<8x256xf32>, i32 -> vector<8x256xf32>
    %c6 = arith.constant 6 : index
    %c0_21 = arith.constant 0 : index
    %c0_22 = arith.constant 0 : index
    %39 = vector.load %arg7[%c6, %c0_21, %c0_22] : memref<9x1x256xf32, #tpu.memory_space<vmem>>, vector<1x1x256xf32>
    %40 = vector.shape_cast %39 : vector<1x1x256xf32> to vector<1x256xf32>
    %41 = vector.broadcast %40 : vector<1x256xf32> to vector<8x256xf32>
    %42 = arith.mulf %38, %41 : vector<8x256xf32>
    %c240_i32 = arith.constant 240 : i32
    %43 = tpu.dynamic_rotate %9 by %c240_i32 dim 1 : vector<8x256xf32>, i32 -> vector<8x256xf32>
    %c7 = arith.constant 7 : index
    %c0_23 = arith.constant 0 : index
    %c0_24 = arith.constant 0 : index
    %44 = vector.load %arg7[%c7, %c0_23, %c0_24] : memref<9x1x256xf32, #tpu.memory_space<vmem>>, vector<1x1x256xf32>
    %45 = vector.shape_cast %44 : vector<1x1x256xf32> to vector<1x256xf32>
    %46 = vector.broadcast %45 : vector<1x256xf32> to vector<8x256xf32>
    %47 = arith.mulf %43, %46 : vector<8x256xf32>
    %c239_i32 = arith.constant 239 : i32
    %48 = tpu.dynamic_rotate %9 by %c239_i32 dim 1 : vector<8x256xf32>, i32 -> vector<8x256xf32>
    %c8 = arith.constant 8 : index
    %c0_25 = arith.constant 0 : index
    %c0_26 = arith.constant 0 : index
    %49 = vector.load %arg7[%c8, %c0_25, %c0_26] : memref<9x1x256xf32, #tpu.memory_space<vmem>>, vector<1x1x256xf32>
    %50 = vector.shape_cast %49 : vector<1x1x256xf32> to vector<1x256xf32>
    %51 = vector.broadcast %50 : vector<1x256xf32> to vector<8x256xf32>
    %52 = arith.mulf %48, %51 : vector<8x256xf32>
    %53 = tpu.concatenate %17, %22, %27, %32, %9, %37, %42, %47, %52 in 0 : vector<8x256xf32>, vector<8x256xf32>, vector<8x256xf32>, vector<8x256xf32>, vector<8x256xf32>, vector<8x256xf32>, vector<8x256xf32>, vector<8x256xf32>, vector<8x256xf32> -> vector<72x256xf32>
    %54 = arith.truncf %53 : vector<72x256xf32> to vector<72x256xbf16>
    %c0_27 = arith.constant 0 : index
    %c0_28 = arith.constant 0 : index
    %55 = vector.load %arg5[%c0_27, %c0_28] : memref<8x72xbf16, #tpu.memory_space<vmem>>, vector<8x72xbf16>
    %cst_29 = arith.constant dense<0.000000e+00> : vector<8x256xf32>
    %56 = tpu.matmul %55, %54, %cst_29 {dimension_numbers = #tpu.dot_dimension_numbers<[1], [0], [0], [1], [0, 0, 1, 1], [], []>} : vector<8x72xbf16>, vector<72x256xbf16>, vector<8x256xf32> -> vector<8x256xf32>
    %57 = tpu.concatenate %12, %56 in 0 : vector<8x256xf32>, vector<8x256xf32> -> vector<16x256xf32>
    %58 = arith.truncf %57 : vector<16x256xf32> to vector<16x256xbf16>
    %c0_30 = arith.constant 0 : index
    %c0_31 = arith.constant 0 : index
    %59 = vector.load %arg8[%c0_30, %c0_31] : memref<256x64xbf16, #tpu.memory_space<vmem>>, vector<256x64xbf16>
    %cst_32 = arith.constant dense<0.000000e+00> : vector<16x64xf32>
    %60 = tpu.matmul %58, %59, %cst_32 {dimension_numbers = #tpu.dot_dimension_numbers<[1], [0], [0], [1], [0, 0, 1, 1], [], []>} : vector<16x256xbf16>, vector<256x64xbf16>, vector<16x64xf32> -> vector<16x64xf32>
    %c0_33 = arith.constant 0 : index
    %c0_34 = arith.constant 0 : index
    %61 = vector.load %arg6[%c0_33, %c0_34] : memref<16x1xf32, #tpu.memory_space<vmem>>, vector<16x1xf32>
    %62 = vector.broadcast %61 : vector<16x1xf32> to vector<16x64xf32>
    %63 = arith.addf %60, %62 : vector<16x64xf32>
    %cst_35 = arith.constant 0.000000e+00 : f32
    %64 = vector.broadcast %cst_35 : f32 to vector<16x64xf32>
    %65 = arith.maximumf %63, %64 : vector<16x64xf32>
    %c0_36 = arith.constant 0 : index
    %c0_37 = arith.constant 0 : index
    %c0_38 = arith.constant 0 : index
    %66 = vector.load %arg9[%c0_36, %c0_37, %c0_38] : memref<1x16x64xf32, #tpu.memory_space<vmem>>, vector<1x16x64xf32>
    %67 = vector.shape_cast %66 : vector<1x16x64xf32> to vector<16x64xf32>
    %68 = vector.shape_cast %65 : vector<16x64xf32> to vector<1x16x64xf32>
    tpu.vector_store %arg9[%c0_36, %c0_37, %c0_38], %68 {strides = array<i32>} : memref<1x16x64xf32, #tpu.memory_space<vmem>>, vector<1x16x64xf32>,
    return
  }
  func.func @transform_0(%arg0: i32) -> (i32, i32, i32) {
    %c0_i32 = arith.constant 0 : i32
    %c0_i32_0 = arith.constant 0 : i32
    %c0_i32_1 = arith.constant 0 : i32
    return %arg0, %c0_i32, %c0_i32_0 : i32, i32, i32
  }
  func.func @transform_1(%arg0: i32) -> (i32, i32) {
    %c0_i32 = arith.constant 0 : i32
    %c0_i32_0 = arith.constant 0 : i32
    %c0_i32_1 = arith.constant 0 : i32
    return %c0_i32, %c0_i32_0 : i32, i32
  }
  func.func @transform_2(%arg0: i32) -> (i32, i32) {
    %c0_i32 = arith.constant 0 : i32
    %c0_i32_0 = arith.constant 0 : i32
    %c0_i32_1 = arith.constant 0 : i32
    return %c0_i32, %c0_i32_0 : i32, i32
  }
  func.func @transform_3(%arg0: i32) -> (i32, i32) {
    %c0_i32 = arith.constant 0 : i32
    %c0_i32_0 = arith.constant 0 : i32
    %c0_i32_1 = arith.constant 0 : i32
    return %c0_i32, %c0_i32_0 : i32, i32
  }
  func.func @transform_4(%arg0: i32) -> (i32, i32) {
    %c0_i32 = arith.constant 0 : i32
    %c0_i32_0 = arith.constant 0 : i32
    %c0_i32_1 = arith.constant 0 : i32
    return %c0_i32, %c0_i32_0 : i32, i32
  }
  func.func @transform_5(%arg0: i32) -> (i32, i32) {
    %c0_i32 = arith.constant 0 : i32
    %c0_i32_0 = arith.constant 0 : i32
    %c0_i32_1 = arith.constant 0 : i32
    return %c0_i32, %c0_i32_0 : i32, i32
  }
  func.func @transform_6(%arg0: i32) -> (i32, i32, i32) {
    %c0_i32 = arith.constant 0 : i32
    %c0_i32_0 = arith.constant 0 : i32
    %c0_i32_1 = arith.constant 0 : i32
    %c0_i32_2 = arith.constant 0 : i32
    return %c0_i32, %c0_i32_0, %c0_i32_1 : i32, i32, i32
  }
  func.func @transform_7(%arg0: i32) -> (i32, i32) {
    %c0_i32 = arith.constant 0 : i32
    %c0_i32_0 = arith.constant 0 : i32
    %c0_i32_1 = arith.constant 0 : i32
    return %c0_i32, %c0_i32_0 : i32, i32
  }
  func.func @transform_8(%arg0: i32) -> (i32, i32, i32) {
    %c0_i32 = arith.constant 0 : i32
    %c0_i32_0 = arith.constant 0 : i32
    %c0_i32_1 = arith.constant 0 : i32
    return %arg0, %c0_i32, %c0_i32_0 : i32, i32, i32
  }
}

</mosaic_0001>

<bundles_post_ra>
// kernel: tpu_custom_call.1
= control target key start
LH: loop header
LB: loop body
LE: loop exit
PB: predicated region body
PF: predicated region fallthrough
CT: control target
= control target key end

     0   :  { %13 = vsyncpa [#allocation3], 0  ;;  %s1458_s0 = inlined_call_operand.vmem [shape: f32[2,4,256], index: 0, kind: input, shape index: {}]   ;;  %s1459_s1 = inlined_call_operand.vmem [shape: bf16[8,4], index: 1, kind: input, shape index: {}]   ;;  %s1460_s2 = inlined_call_operand.vmem [shape: f32[8,1], index: 2, kind: input, shape index: {}]   ;;  %s1461_s3 = inlined_call_operand.vmem [shape: bf16[8,8], index: 3, kind: input, shape index: {}]   ;;  %s1462_s4 = inlined_call_operand.vmem [shape: bf16[8,72], index: 4, kind: input, shape index: {}]   ;;  %s1463_s5 = inlined_call_operand.vmem [shape: f32[16,1], index: 5, kind: input, shape index: {}]   ;;  %s1464_s6 = inlined_call_operand.vmem [shape: f32[9,1,256], index: 6, kind: input, shape index: {}]   ;;  %s1465_s7 = inlined_call_operand.vmem [shape: bf16[256,64], index: 7, kind: input, shape index: {}]   ;;  %s1466_s8 = inlined_call_operand.hbm [shape: f32[2,16,64], index: 8, kind: output, shape index: {}]  }
   0x1   :  { %15 = vsyncpa [#allocation3 + $0x1], 0  ;;  %s1185_s27 = smov 0   ;;  %s1187_s28 = smov 0  }
   0x2   :  { %s1189_s29 = smov 0   ;;  %s1191_s30 = smov 0  }
   0x3 LB: > { %s1206_s9 = sadd.s32 4294967295, %s1126_s30   ;;  %s930_s10 = sadd.s32 4294967294, %s1126_s30   ;;  %s1126_s30 = sphi %s1191_s30, %s1472_s30   ;;  %s1122_s29 = sphi %s1189_s29, %s1471_s29   ;;  %s1118_s28 = sphi %s1187_s28, %s1470_s28   ;;  %s1114_s27 = sphi %s1185_s27, %s1469_s27  }
   0x4   : > { %s1210_s11 = sadd.s32 1, %s1126_s30   ;;  %s201_s12 = sadd.s32 1, %s1122_s29 }
   0x5   : > { %s198_s13 = ssub.s32 %s1126_s30, %s1210_s11  ;;  %p211_p0 = scmp.ne.s32.totalorder %s1122_s29, %s1118_s28 }
   0x6   : > { %p199_p1 = scmp.eq.s32.totalorder %s198_s13, 0  ;;  %p212_p2 = scmp.eq.s32.totalorder %s1206_s9, 1 }
   0x7   : > { %p217_p3 = scmp.ne.s32.totalorder %s1118_s28, %s1114_s27  ;;  %p218_p4 = scmp.eq.s32.totalorder %s930_s10, 1 }
   0x8   : > { %s1221_s14 = scalar_select %p199_p1, %s1122_s29, %s201_s12  }
   0x9   : > { %p1223_p5 = por %p212_p2, %p211_p0  ;;  %p1227_p6 = por %p218_p4, %p217_p3 }
   0xa   : > { %p933_p7 = scmp.ge.s32.totalorder %s1126_s30, 1  ;;  %p265_p8 = scmp.lt.s32.totalorder %s1126_s30, 3 }
   0xc   : > { %p266_p9 = pnand %p933_p7, %p265_p8 }
   0xd   : > { %p299_p10 = scmp.lt.s32.totalorder (!%p266_p9), %s1206_s9, 1  ;;  %v1128_v0 = vmov (!%p266_p9), 0   ;;  %v312_v1 = vld [vmem:[%s1460_s2] sm:$0xff] (!%p266_p9)  ;;  %vm322_vm0 = vcmask (!%p266_p9), 1041408   ;;  %vm318_vm1 = vcmask (!%p266_p9), 31744   ;;  %vm379_vm2 = vcmask (!%p266_p9), 1043456  }
   0xe   : > { %269 = sbr.rel (%p266_p9) target bundleno = 854 (0x356), region = 52  ;;  %361 = vmatprep.mubr.bf16.mxu0 (!%p266_p9), %v1128_v0  ;;  %1045 = vset.pattern.permute.xlu0 (!%p266_p9), %v1128_v0  ;;  %v311_v7 = vld [vmem:[%s1459_s1] sm:$0xf] (!%p266_p9)  ;;  %s1129_s26 = smov (!%p266_p9), 16   ;;  %vm375_vm3 = vcmask (!%p266_p9), 64512   ;;  %v701_v21 = vld [vmem:[%s1463_s5 + $0x8] sm:$0xff] (!%p266_p9)  ;;  %v431_v35 = vlaneseq (!%p266_p9) }
   0xf   : > { %315 = vperm.xlu0 (!%p266_p9), %1045, %v312_v1   ;;  %1046 = vset.pattern.permute.xlu1 (!%p266_p9), %v1128_v0  ;;  %s1130_s10 = smov (!%p266_p9), 17   ;;  %s1131_s12 = smov (!%p266_p9), 15   ;;  %v372_v20 = vld [vmem:[%s1461_s3] sm:$0xf] (!%p266_p9)  ;;  %v1050_v24 = vld [vmem:[%s1465_s7 + $0x48] sm:$0xff] (!%p266_p9)   ;;  %v1052_v26 = vld [vmem:[%s1465_s7 + $0x50] sm:$0xff] (!%p266_p9)  }
  0x10   : > { %s1132_s18 = smov (!%p266_p9), 1   ;;  %s1135_s21 = smov (!%p266_p9), 112   ;;  %v1048_v22 = vld [vmem:[%s1465_s7 + $0x40] sm:$0xff] (!%p266_p9)   ;;  %v1051_v25 = vld [vmem:[%s1465_s7 + $0x8] sm:$0xff] (!%p266_p9)   ;;  %v1053_v27 = vld [vmem:[%s1465_s7 + $0x10] sm:$0xff] (!%p266_p9)   ;;  %v439_v39 = vshrl.u32 (!%p266_p9), %v431_v35, 7 }
  0x11   : > { %s1136_s22 = smov (!%p266_p9), 111   ;;  %v1049_v23 = vld [vmem:[%s1465_s7] sm:$0xff] (!%p266_p9)   ;;  %973 = vmatprep.subr.bf16.mxu1 (!%p266_p9), %v1048_v22  ;;  %v1054_v28 = vld [vmem:[%s1465_s7 + $0x58] sm:$0xff] (!%p266_p9)   ;;  %v1058_v32 = vld [vmem:[%s1465_s7 + $0x68] sm:$0xff] (!%p266_p9)   ;;  %v1318_v40 = vand.u32 (!%p266_p9), 127, %v431_v35  ;;  %vm615_vm12 = vcmask (!%p266_p9), 588800  }
  0x12   : > { %974 = vmatpush3.bf16.msra.mxu1 (!%p266_p9), %v1049_v23  ;;  %v1055_v29 = vld [vmem:[%s1465_s7 + $0x18] sm:$0xff] (!%p266_p9)   ;;  %v1056_v30 = vld [vmem:[%s1465_s7 + $0x60] sm:$0xff] (!%p266_p9)   ;;  %v1059_v33 = vld [vmem:[%s1465_s7 + $0x28] sm:$0xff] (!%p266_p9)   ;;  %v1320_v42 = vsub.s32 (!%p266_p9), 0, %v439_v39  ;;  %v1322_v43 = vsub.s32 (!%p266_p9), 1, %v439_v39  ;;  %s296_s25 = sand.u32 (!%p266_p9), 1, %s1118_s28  }
  0x13   : > { %975 = vmatprep.subr.bf16.mxu1 (!%p266_p9), %v1050_v24  ;;  %v1057_v31 = vld [vmem:[%s1465_s7 + $0x20] sm:$0xff] (!%p266_p9)   ;;  %v1060_v34 = vld [vmem:[%s1465_s7 + $0x70] sm:$0xff] (!%p266_p9)   ;;  %vm454_vm4 = vcmp.lt.s32.totalorder (!%p266_p9), %v1318_v40, 16  ;;  %vm476_vm5 = vcmp.lt.s32.totalorder (!%p266_p9), %v1318_v40, 15  ;;  %vm433_vm6 = vcmp.lt.s32.totalorder (!%p266_p9), %v1318_v40, 17  ;;  %vm498_vm7 = vcmp.lt.s32.totalorder (!%p266_p9), %v1318_v40, 1 }
  0x14   : > { %v1061_v36 = vld [vmem:[%s1465_s7 + $0x30] sm:$0xff] (!%p266_p9)   ;;  %v941_v45 = vld [vmem:[%s1464_s6 + $0x2] sm:$0x3] (!%p266_p9)  ;;  %v436_v46 = vld [vmem:[%s1464_s6] sm:$0x3] (!%p266_p9)  ;;  %vm520_vm8 = vcmp.lt.s32.totalorder (!%p266_p9), %v1318_v40, 127 }
  0x15   : > { %s300_s19 = scalar_select %p299_p10, %s1206_s9, 1  ;;  %v943_v47 = vld [vmem:[%s1464_s6 + $0x6] sm:$0x3]  ;;  %v463_v48 = vrot.slane %v941_v45, %v1320_v42  ;;  %v467_v49 = vrot.slane %v941_v45, %v1322_v43  ;;  %v942_v51 = vld [vmem:[%s1464_s6 + $0x4] sm:$0x3]  ;;  %v441_v56 = vrot.slane %v436_v46, %v1320_v42  ;;  %v445_v57 = vrot.slane %v436_v46, %v1322_v43 }
  0x16   : > { %976 = vmatpush3.bf16.msra.mxu1 %v1051_v25  ;;  %v944_v55 = vld [vmem:[%s1464_s6 + $0xa] sm:$0x3]  ;;  %v511_v58 = vrot.slane %v943_v47, %v1322_v43  ;;  %v489_v59 = vrot.slane %v942_v51, %v1322_v43  ;;  %v507_v60 = vrot.slane %v943_v47, %v1320_v42  ;;  %v945_v24 = vld [vmem:[%s1464_s6 + $0xc] sm:$0x3]  ;;  %vm542_vm9 = vcmp.lt.s32.totalorder %v1318_v40, 113  ;;  %s972_s13 = sshll.u32 %s1206_s9, 8 }
  0x17   : > { %s971_s20 = sshll.u32 %s300_s19, 3  ;;  %s1133_s19 = smov 127   ;;  %977 = vmatprep.subr.bf16.mxu1 %v1052_v26  ;;  %v533_v1 = vrot.slane %v944_v55, %v1322_v43  ;;  %vm564_vm10 = vcmp.lt.s32.totalorder %v1318_v40, 112  ;;  %vm586_vm11 = vcmp.lt.s32.totalorder %v1318_v40, 111  ;;  %vm851_vm13 = vcmask 523264  }
  0x18   : > { %s303_s23 = scalar_lea.vmem %s1458_s0, %s971_s20  ;;  %s1134_s20 = smov 113  }
  0x19   : > { %v305_v2 = vld [vmem:[%s303_s23] sm:$0xff]  ;;  %s1137_s9 = smov [#allocation2]  }
  0x1a   : > { %v307_v3 = vcombine.high %v305_v2, %v305_v2  ;;  %v309_v4 = vpack.c.bf16 %v305_v2, %v305_v2  ;;  %978 = vmatpush3.bf16.msra.mxu1 %v1053_v27  ;;  %v946_v27 = vld [vmem:[%s1464_s6 + $0xe] sm:$0x3] }
  0x1b   : > { %979 = vmatprep.subr.bf16.mxu1 %v1054_v28  ;;  %v573_v35 = vrot.slane %v946_v27, %v1320_v42 }
  0x1c   : > { %v310_v5 = vpack.c.bf16 %v307_v3, %v307_v3  ;;  %v324_v6 = vsel %vm322_vm0, %v309_v4, 0 }
  0x1e   : > { %937 = vmatprep.subr.msk.bf16.mxu0 %vm322_vm0, %v310_v5  ;;  %980 = vmatpush3.bf16.msra.mxu1 %v1055_v29 }
  0x1f   : > { %330 = vmatpush1.bf16.msra.mxu0 %v324_v6  ;;  %981 = vmatprep.subr.bf16.mxu1 %v1056_v30 }
  0x22   : > { %938 = vmatmul.mubr.msk.bf16.vlgmr.msra.gmra.mrb[0].mxu0 %vm318_vm1, %v311_v7  ;;  %982 = vmatpush3.bf16.msra.mxu1 %v1057_v31 }
  0x23   : > { %418 = vmatprep.mubr.bf16.mxu0 %v1128_v0  ;;  %983 = vmatprep.subr.bf16.mxu1 %v1058_v32  ;;  %v551_v32 = vrot.slane %v945_v24, %v1320_v42 }
  0x26   : > { %984 = vmatpush3.bf16.msra.mxu1 %v1059_v33  ;;  %v555_v33 = vrot.slane %v945_v24, %v1322_v43 }
  0x27   : > { %985 = vmatprep.subr.bf16.mxu1 %v1060_v34  ;;  %v947_v34 = vld [vmem:[%s1464_s6 + $0x10] sm:$0x3] }
  0x28   : > { %v595_v45 = vrot.slane %v947_v34, %v1320_v42 }
  0x2a   : > { %986 = vmatpush3.bf16.msra.mxu1 %v1061_v36  ;;  %v577_v36 = vrot.slane %v946_v27, %v1322_v43 }
  0x8e   : > { %v316_v8 = vpop.permute.xlu0 %315 }
  0xf5   : > { %v363_v9 = vpop.f32.mrb[0].mxu0 }
  0xf6   : > { %v364_v10 = vadd.f32 %v363_v9, %v316_v8  ;;  %v365_v11 = vpop.f32.mrb[1].mxu0 }
  0xf7   : > { %v366_v12 = vadd.f32 %v365_v11, %v316_v8  ;;  %v367_v13 = vpop.f32.mrb[2].mxu0 }
  0xf8   : > { %v1244_v14 = vmax.f32 %v364_v10, 0.0  ;;  %v368_v15 = vpop.f32.mrb[3].mxu0  ;;  %v485_v10 = vrot.slane %v942_v51, %v1320_v42 }
  0xf9   : > { %v1246_v16 = vmax.f32 %v366_v12, 0.0 }
  0xfa   : > { %450 = vrot.lane.b32.xlu1 %v1244_v14, %s1129_s26  ;;  %427 = vrot.lane.b32.xlu0 %v1244_v14, %s1130_s10  ;;  %v373_v17 = vpack.c.bf16 %v1244_v14, %v1244_v14 }
  0xfb   : > { %v374_v18 = vpack.c.bf16 %v1246_v16, %v1246_v16 }
  0xfc   : > { %v381_v19 = vsel %vm379_vm2, %v373_v17, 0 }
  0xfd   : > { %939 = vmatprep.subr.msk.bf16.mxu0 %vm379_vm2, %v374_v18 }
  0xfe   : > { %472 = vrot.lane.b32.xlu1 %v1244_v14, %s1131_s12  ;;  %452 = vrot.lane.b32.xlu0 %v1246_v16, %s1129_s26  ;;  %s934_s26 = sshll.u32 %s296_s25, 4 }
  0xff   : > { %387 = vmatpush1.bf16.msra.mxu0 %v381_v19 }
 0x102   : > { %494 = vrot.lane.b32.xlu1 %v1244_v14, %s1132_s18  ;;  %474 = vrot.lane.b32.xlu0 %v1246_v16, %s1131_s12 }
 0x103   : > { %940 = vmatmul.mubr.msk.bf16.vlgmr.msra.gmra.mrb[4].mxu0 %vm375_vm3, %v372_v20  ;;  %v529_v20 = vrot.slane %v944_v55, %v1320_v42 }
 0x104   : > { %657 = vmatprep.mubr.bf16.mxu0 %v1128_v0 }
 0x106   : > { %429 = vrot.lane.b32.xlu1 %v1246_v16, %s1130_s10  ;;  %496 = vrot.lane.b32.xlu0 %v1246_v16, %s1132_s18  ;;  %s298_s10 = scalar_lea.vmem [#allocation2], %s934_s26 }
 0x107   : > { %s868_s12 = sshll.u32 %s298_s10, 4  ;;  %s1410_s12 = int_to_ptr.vmem [resolvable:$true] %s868_s12 }
 0x10a   : > { %516 = vrot.lane.b32.xlu1 %v1244_v14, %s1133_s19  ;;  %518 = vrot.lane.b32.xlu0 %v1246_v16, %s1133_s19  ;;  %s1415_s19 = scalar_lea.hbm %s1466_s8, %s972_s13 }
 0x10e   : > { %538 = vrot.lane.b32.xlu1 %v1244_v14, %s1134_s20  ;;  %540 = vrot.lane.b32.xlu0 %v1246_v16, %s1134_s20  ;;  %s1417_s20 = scalar_lea.sflag [#allocation3], %s296_s25 }
 0x112   : > { %560 = vrot.lane.b32.xlu1 %v1244_v14, %s1135_s21  ;;  %562 = vrot.lane.b32.xlu0 %v1246_v16, %s1135_s21  ;;  %s1064_s21 = scalar_lea.vmem %s1410_s12, 256 }
 0x113   : > { %p1065_p11 = scmp.ne.s32.totalorder %s1410_s12, %s1064_s21 }
 0x115   : > { %p1066_p12 = pnand %p1065_p11, %p1223_p5 }
 0x116   : > { %582 = vrot.lane.b32.xlu1 %v1244_v14, %s1136_s22  ;;  %584 = vrot.lane.b32.xlu0 %v1246_v16, %s1136_s22  ;;  %s1068_s22 = sshll.u32 %s1137_s9, 4  ;;  %s1069_s22 = int_to_ptr.vmem [resolvable:$false] %s1068_s22 }
 0x117   : > { %p1067_p13 = pneg %p1066_p12  ;;  %s1070_s23 = scalar_lea.vmem %s1069_s22, 512 }
 0x118   : > { %p1071_p0 = scmp.lt.s32.totalorder %s1410_s12, %s1069_s22  ;;  %p1072_p1 = scmp.lt.s32.totalorder %s1070_s23, %s1064_s21 }
 0x11a   : > { %709 = vperm.xlu0 %1045, %v701_v21   ;;  %p1073_p2 = por %p1072_p1, %p1071_p0 }
 0x11c   : > { %p1074_p3 = pnand %p1073_p2, %p1067_p13 }
 0x16c   : > { %v451_v37 = vpop.permute.xlu1 %450  ;;  %v428_v38 = vpop.permute.xlu0 %427 }
 0x170   : > { %v473_v41 = vpop.permute.xlu1 %472  ;;  %v453_v44 = vpop.permute.xlu0 %452 }
 0x171   : > { %v455_v53 = vsel %vm454_vm4, %v451_v37, %v453_v44  ;;  %v456_v54 = vsel %vm454_vm4, %v453_v44, %v451_v37 }
 0x172   : > { %v470_v61 = vmul.f32 %v463_v48, %v456_v54  ;;  %v471_v62 = vmul.f32 %v467_v49, %v455_v53  ;;  %v599_v49 = vrot.slane %v947_v34, %v1322_v43 }
 0x174   : > { %v495_v50 = vpop.permute.xlu1 %494  ;;  %v475_v52 = vpop.permute.xlu0 %474 }
 0x175   : > { %v477_v2 = vsel %vm476_vm5, %v473_v41, %v475_v52  ;;  %v478_v11 = vsel %vm476_vm5, %v475_v52, %v473_v41 }
 0x176   : > { %v493_v12 = vmul.f32 %v489_v59, %v477_v2  ;;  %v492_v26 = vmul.f32 %v485_v10, %v478_v11  ;;  %v1063_v2 = vld [vmem:[%s1465_s7 + $0x38] sm:$0xff]  }
 0x178   : > { %v430_v63 = vpop.permute.xlu1 %429  ;;  %v497_v0 = vpop.permute.xlu0 %496 }
 0x179   : > { %v434_v3 = vsel %vm433_vm6, %v428_v38, %v430_v63  ;;  %v435_v4 = vsel %vm433_vm6, %v430_v63, %v428_v38  ;;  %v499_v5 = vsel %vm498_vm7, %v495_v50, %v497_v0  ;;  %v500_v8 = vsel %vm498_vm7, %v497_v0, %v495_v50 }
 0x17a   : > { %v448_v6 = vmul.f32 %v441_v56, %v435_v4  ;;  %v449_v7 = vmul.f32 %v445_v57, %v434_v3  ;;  %v515_v9 = vmul.f32 %v511_v58, %v499_v5  ;;  %v514_v19 = vmul.f32 %v507_v60, %v500_v8  ;;  %v700_v3 = vld [vmem:[%s1463_s5] sm:$0xff] }
 0x17b   : > { %704 = vperm.xlu1 %1046, %v700_v3  }
 0x17c   : > { %v604_v13 = vpack.c.bf16 %v470_v61, %v448_v6  ;;  %v517_v15 = vpop.permute.xlu1 %516  ;;  %v519_v17 = vpop.permute.xlu0 %518  ;;  %v605_v18 = vpack.c.bf16 %v471_v62, %v449_v7  ;;  %v607_v25 = vpack.c.bf16 %v515_v9, %v493_v12  ;;  %v606_v30 = vpack.c.bf16 %v514_v19, %v492_v26  ;;  %v614_v61 = vld [vmem:[%s1462_s4] sm:$0xf] }
 0x17d   : > { %v522_v21 = vsel %vm520_vm8, %v519_v17, %v517_v15  ;;  %v521_v22 = vsel %vm520_vm8, %v517_v15, %v519_v17 }
 0x17e   : > { %v537_v23 = vmul.f32 %v533_v1, %v522_v21  ;;  %625 = vmatprep.subr.bf16.mxu0 %v605_v18  ;;  %v536_v31 = vmul.f32 %v529_v20, %v521_v22  ;;  %v1062_v1 = vld [vmem:[%s1465_s7 + $0x78] sm:$0xff]  }
 0x17f   : > { %626 = vmatpush1.bf16.msra.mxu0 %v604_v13  ;;  %987 = vmatprep.subr.bf16.mxu1 %v1062_v1 }
 0x180   : > { %v539_v28 = vpop.permute.xlu1 %538  ;;  %v541_v29 = vpop.permute.xlu0 %540  ;;  %627 = vmatprep.subr.bf16.mxu0 %v607_v25  ;;  %v609_v37 = vpack.c.bf16 %v537_v23, %v1246_v16  ;;  %v608_v46 = vpack.c.bf16 %v536_v31, %v1244_v14  ;;  %988 = vmatpush3.bf16.msra.mxu1 %v1063_v2 }
 0x181   : > { %v543_v38 = vsel %vm542_vm9, %v539_v28, %v541_v29  ;;  %v544_v39 = vsel %vm542_vm9, %v541_v29, %v539_v28 }
 0x182   : > { %v558_v50 = vmul.f32 %v551_v32, %v543_v38  ;;  %v559_v51 = vmul.f32 %v555_v33, %v544_v39 }
 0x183   : > { %628 = vmatpush1.bf16.msra.mxu0 %v606_v30 }
 0x184   : > { %v561_v41 = vpop.permute.xlu1 %560  ;;  %v563_v44 = vpop.permute.xlu0 %562  ;;  %629 = vmatprep.subr.bf16.mxu0 %v609_v37 }
 0x185   : > { %v565_v47 = vsel %vm564_vm10, %v561_v41, %v563_v44  ;;  %v566_v48 = vsel %vm564_vm10, %v563_v44, %v561_v41 }
 0x186   : > { %v580_v52 = vmul.f32 %v573_v35, %v565_v47  ;;  %v581_v16 = vmul.f32 %v577_v36, %v566_v48 }
 0x187   : > { %630 = vmatpush1.bf16.msra.mxu0 %v608_v46 }
 0x188   : > { %v610_v53 = vpack.c.bf16 %v580_v52, %v558_v50  ;;  %v583_v54 = vpop.permute.xlu1 %582  ;;  %v585_v55 = vpop.permute.xlu0 %584  ;;  %v611_v56 = vpack.c.bf16 %v581_v16, %v559_v51 }
 0x189   : > { %v587_v57 = vsel %vm586_vm11, %v583_v54, %v585_v55  ;;  %v588_v42 = vsel %vm586_vm11, %v585_v55, %v583_v54 }
 0x18a   : > { %v602_v14 = vmul.f32 %v595_v45, %v587_v57  ;;  %v603_v58 = vmul.f32 %v599_v49, %v588_v42  ;;  %631 = vmatprep.subr.bf16.mxu0 %v611_v56 }
 0x18b   : > { %632 = vmatpush1.bf16.msra.mxu0 %v610_v53 }
 0x18c   : > { %v612_v43 = vpack.c.bf16 %v602_v14, %v602_v14  ;;  %v613_v59 = vpack.c.bf16 %v603_v58, %v603_v58 }
 0x18e   : > { %948 = vmatprep.subr.msk.bf16.mxu0 %vm379_vm2, %v613_v59  ;;  %v620_v60 = vsel %vm379_vm2, %v612_v43, 0 }
 0x18f   : > { %634 = vmatpush1.bf16.msra.mxu0 %v620_v60 }
 0x192   : > { %949 = vmatmul.mubr.msk.bf16.vlgmr.msra.gmra.mrb[8].mxu0 %vm615_vm12, %v614_v61 }
 0x199   : > { %v710_v20 = vpop.permute.xlu0 %709 }
 0x1d6   : > { %v420_v62 = vpop.f32.mrb[4].mxu0 }
 0x1d7   : > { %v422_v40 = vpop.f32.mrb[5].mxu0 }
 0x1d8   : > { %v424_v63 = vpop.f32.mrb[6].mxu0 }
 0x1d9   : > { %v425_v0 = vpop.f32.mrb[7].mxu0 }
 0x1fa   : > { %v705_v12 = vpop.permute.xlu1 %704 }
 0x265   : > { %v659_v4 = vpop.f32.mrb[8].mxu0 }
 0x266   : > { %v666_v5 = vpack.c.bf16 %v659_v4, %v420_v62  ;;  %v661_v6 = vpop.f32.mrb[9].mxu0 }
 0x267   : > { %v663_v7 = vpop.f32.mrb[10].mxu0  ;;  %v667_v8 = vpack.c.bf16 %v661_v6, %v422_v40 }
 0x268   : > { %v664_v9 = vpop.f32.mrb[11].mxu0 }
 0x269   : > { %840 = vmatprep.mubr.bf16.mxu1 %v667_v8 }
 0x26a   : > { %841 = vmatmul.mubr.bf16.vlgmr.msra.gmra.mrb[0].mxu1 %v666_v5 }
 0x33d   : > { %v989_v10 = vpop.f32.mrb[0].mxu1 }
 0x33e   : > { %v990_v11 = vpop.f32.mrb[1].mxu1 }
 0x33f   : > { %v991_v13 = vadd.f32 %v990_v11, %v989_v10  ;;  %v992_v15 = vpop.f32.mrb[2].mxu1 }
 0x340   : > { %v993_v17 = vpop.f32.mrb[3].mxu1 }
 0x341   : > { %v843_v18 = vadd.f32 %v991_v13, %v705_v12  ;;  %v994_v19 = vadd.f32 %v993_v17, %v992_v15 }
 0x343   : > { %v849_v21 = vmax.f32 %v843_v18, 0.0  ;;  %v846_v22 = vadd.f32 %v994_v19, %v710_v20 }
 0x345   : > { %852 = vst.msk [vmem:[%s298_s10] sm:$0xff] %vm851_vm13, %v849_v21  ;;  %v850_v23 = vmax.f32 %v846_v22, 0.0 }
 0x347   : > { %853 = vst.msk [vmem:[%s298_s10 + $0x8] sm:$0xff] %vm851_vm13, %v850_v23 }
 0x348   : > { %1077 = shalt.err (!%p1074_p3)
}
 0x349   : > { %s1078_s24 = scalar_lea.hbm %s1415_s19, 256  ;;  %s1082_s10 = scalar_lea.hbm %s1466_s8, 512 }
 0x34a   : > { %p1079_p4 = scmp.ne.s32.totalorder %s1415_s19, %s1078_s24  ;;  %p1083_p9 = scmp.lt.u32.totalorder %s1415_s19, %s1466_s8 }
 0x34b   : > { %p1084_p10 = scmp.lt.u32.totalorder %s1082_s10, %s1078_s24  ;;  %p1086_p12 = scmp.lt.u32.totalorder %s1078_s24, %s1415_s19 }
 0x34c   : > { %p1080_p7 = pnand %p1079_p4, %p1223_p5 }
 0x34d   : > { %p1085_p11 = por %p1084_p10, %p1083_p9 }
 0x34e   : > { %p1081_p8 = pneg %p1080_p7 }
 0x34f   : > { %p1087_p13 = por %p1086_p12, %p1085_p11 }
 0x351   : > { %p1088_p0 = pnand %p1087_p13, %p1081_p8 }
 0x353   : > { %1091 = shalt.err (!%p1088_p0)
}
 0x354   : > { %s1138_s18 = smov 128   ;;  %s1139_s21 = smov 8  }
 0x355   : > { %995 = dma.vmem_to_hbm [thread:$0]  (%p1223_p5), %s1410_s12, 256, %s1415_s19, %s1417_s20, %s1138_s18, %s1138_s18, %s1139_s21  }
 0x356 PF: > { %p1001_p1 = scmp.ge.s32.totalorder %s1126_s30, 2  ;;  %s883_s9 = sand.u32 1, %s1114_s27  }
 0x357   : > { %s884_s22 = scalar_lea.sflag [#allocation3], %s883_s9 }
 0x358   : > { %p998_p2 = pnand %p1001_p1, %p1227_p6 }
 0x35a   : > { %1109 = dma.done.wait (!%p998_p2), %s884_s22, 256  }
 0x35b   : > { %1111 = vsyncadd (!%p998_p2), %s884_s22, 4294967040  ;;  %p18_p3 = scmp.ge.s32.totalorder %s1210_s11, 4   ;;  %s1469_s27 = smov %s1118_s28 }
 0x35c   : > { %s1470_s28 = smov %s1122_s29  ;;  %s1471_s29 = smov %s1221_s14 }
 0x35d   : > { %s1472_s30 = smov %s1210_s11  ;;  %20 = sbr.rel (!%p18_p3) target bundleno = 3 (0x3), region = 94 }
 0x364   :  { %889 = vsyncpa [#allocation3], 1 }
 0x365   :  { %891 = vsyncpa [#allocation3 + $0x1], 1 }

</bundles_post_ra>
